<compile_context>
chip_gen: v6e
topology: v6e:2x2x1
jax: 0.10.0
libtpu: 0.0.40
codegen_flags: <defaults>
</compile_context>

<pallas_src>
import jax
import jax.numpy as jnp
from jax.experimental import pallas as pl
from jax.experimental.pallas import tpu as pltpu


def _make_kernel(H, W, KH, KW):
    HW = H * W

    def kernel(w_ref, x_ref, o_ref):
        # w_ref : (KH*KW,) f32 in SMEM -- the shared filter, scalar reads.
        # x_ref : (P, H*W)             -- one plane per sublane row, lane-dense.
        # o_ref : (P, H*W)             -- valid outputs at j = ho*W + wo,
        #                                 ho < Ho, wo < Wo (tail discarded).
        xv = x_ref[...].astype(jnp.float32)

        # Row (dy) shifts: lane-rolls by dy*W, computed once and shared across
        # all dx taps (XLU slot; KH-1 = 2 rolls).
        rows = [xv]
        for dy in range(1, KH):
            rows.append(pltpu.roll(xv, shift=HW - dy * W, axis=1))

        acc = None
        for dx in range(KW):
            # Column partial sum: pure VPU scalar-x-vector multiply-adds.
            col = rows[0] * w_ref[dx]
            for dy in range(1, KH):
                col = col + rows[dy] * w_ref[dy * KW + dx]
            # Column (dx) shift applied to the partial sum (KW-1 = 2 rolls).
            if dx:
                col = pltpu.roll(col, shift=HW - dx, axis=1)
            acc = col if acc is None else acc + col

        o_ref[...] = acc.astype(o_ref.dtype)

    return kernel


def shared_conv_forward(x_nchw, shared_kernel):
    """x_nchw: (N, C, H, W); shared_kernel: (KH, KW) = the Conv2d(1,1,k) weight."""
    N, C, H, W = x_nchw.shape
    KH, KW = shared_kernel.shape
    Ho, Wo = H - KH + 1, W - KW + 1
    P, HW = N * C, H * W

    # Native-layout input: contiguous reshape == bitcast, no HBM repack pass.
    x_flat = x_nchw.reshape(P, HW)
    # Flat 1-D SMEM weights (64 B instead of a padded 2-D SMEM block).
    w_flat = shared_kernel.astype(jnp.float32).reshape(KH * KW)

    kern = _make_kernel(H, W, KH, KW)

    o_flat = pl.pallas_call(
        kern,
        out_shape=jax.ShapeDtypeStruct((P, HW), x_nchw.dtype),
        grid=(1,),  # single VMEM-resident block at these shapes (see TODOs)
        in_specs=[
            pl.BlockSpec(memory_space=pltpu.MemorySpace.SMEM),  # (9,) weights
            pl.BlockSpec((P, HW), lambda i: (0, 0)),
        ],
        out_specs=pl.BlockSpec((P, HW), lambda i: (0, 0)),
        compiler_params=pltpu.CompilerParams(
            dimension_semantics=("parallel",)),
    )(w_flat, x_flat)

    # Drop the invalid tail rows/cols of the valid conv (free reshapes + one
    # tiny slice; no transposes).
    return o_flat.reshape(N, C, H, W)[:, :, :Ho, :Wo]


def shared_conv_reference(x_nchw, shared_kernel):
    """Plain-JAX reference with identical semantics (for verification)."""
    N, C, H, W = x_nchw.shape
    KH, KW = shared_kernel.shape
    Ho, Wo = H - KH + 1, W - KW + 1
    xf = x_nchw.astype(jnp.float32)
    kf = shared_kernel.astype(jnp.float32)
    out = jnp.zeros((N, C, Ho, Wo), jnp.float32)
    for dy in range(KH):
        for dx in range(KW):
            out = out + kf[dy, dx] * xf[:, :, dy:dy + Ho, dx:dx + Wo]
    return out.astype(x_nchw.dtype)


if __name__ == "__main__":
    # SharedConv(in_channels=4) on a (2, 4, 16, 16) input, default 3x3/valid conv.
    N, C, H, W = 2, 4, 16, 16
    KH = KW = 3

    key = jax.random.PRNGKey(0)
    kx, kw = jax.random.split(key)

    x = jax.random.normal(kx, (N, C, H, W), dtype=jnp.float32)
    # nn.Conv2d(1, 1, 3, bias=False).weight has shape (1, 1, 3, 3)
    shared_w = jax.random.normal(kw, (1, 1, KH, KW), dtype=jnp.float32) * 0.2

    fwd = jax.jit(shared_conv_forward)
    out = jax.block_until_ready(fwd(x, shared_w[0, 0]))

    ref = shared_conv_reference(x, shared_w[0, 0])
    assert out.shape == (N, C, H - KH + 1, W - KW + 1)
    assert jnp.allclose(out, ref, atol=1e-4, rtol=1e-4), "mismatch vs reference"

    print("KERNEL_OK")
</pallas_src>

<mosaic_0001>
module attributes {stable_mosaic.version = 11 : i64} {
  func.func @kernel(%arg0: i32, %arg1: memref<9xf32, #tpu.memory_space<smem>>, %arg2: memref<8x256xf32, #tpu.memory_space<vmem>>, %arg3: memref<8x256xf32, #tpu.memory_space<vmem>>) attributes {dimension_semantics = [#tpu.dimension_semantics<parallel>], iteration_bounds = array<i64: 1>, scalar_prefetch = 0 : i64, scratch_operands = 0 : i64, tpu.core_type = #tpu.core_type<tc>, window_params = [{transform_indices = @transform_0, window_bounds = array<i64: 9>}, {pipeline_mode = #tpu.pipeline_mode<synchronous>, transform_indices = @transform_1, window_bounds = array<i64: 8, 256>}, {pipeline_mode = #tpu.pipeline_mode<synchronous>, transform_indices = @transform_2, window_bounds = array<i64: 8, 256>}]} {
    %c0 = arith.constant 0 : index
    %c0_0 = arith.constant 0 : index
    %0 = vector.load %arg2[%c0, %c0_0] : memref<8x256xf32, #tpu.memory_space<vmem>>, vector<8x256xf32>
    %c240_i32 = arith.constant 240 : i32
    %1 = tpu.dynamic_rotate %0 by %c240_i32 dim 1 : vector<8x256xf32>, i32 -> vector<8x256xf32>
    %c224_i32 = arith.constant 224 : i32
    %2 = tpu.dynamic_rotate %0 by %c224_i32 dim 1 : vector<8x256xf32>, i32 -> vector<8x256xf32>
    %c0_1 = arith.constant 0 : index
    %3 = memref.load %arg1[%c0_1] : memref<9xf32, #tpu.memory_space<smem>>
    %4 = vector.broadcast %3 : f32 to vector<8x256xf32>
    %5 = arith.mulf %0, %4 : vector<8x256xf32>
    %c3 = arith.constant 3 : index
    %6 = memref.load %arg1[%c3] : memref<9xf32, #tpu.memory_space<smem>>
    %7 = vector.broadcast %6 : f32 to vector<8x256xf32>
    %8 = arith.mulf %1, %7 : vector<8x256xf32>
    %9 = arith.addf %5, %8 : vector<8x256xf32>
    %c6 = arith.constant 6 : index
    %10 = memref.load %arg1[%c6] : memref<9xf32, #tpu.memory_space<smem>>
    %11 = vector.broadcast %10 : f32 to vector<8x256xf32>
    %12 = arith.mulf %2, %11 : vector<8x256xf32>
    %13 = arith.addf %9, %12 : vector<8x256xf32>
    %c1 = arith.constant 1 : index
    %14 = memref.load %arg1[%c1] : memref<9xf32, #tpu.memory_space<smem>>
    %15 = vector.broadcast %14 : f32 to vector<8x256xf32>
    %16 = arith.mulf %0, %15 : vector<8x256xf32>
    %c4 = arith.constant 4 : index
    %17 = memref.load %arg1[%c4] : memref<9xf32, #tpu.memory_space<smem>>
    %18 = vector.broadcast %17 : f32 to vector<8x256xf32>
    %19 = arith.mulf %1, %18 : vector<8x256xf32>
    %20 = arith.addf %16, %19 : vector<8x256xf32>
    %c7 = arith.constant 7 : index
    %21 = memref.load %arg1[%c7] : memref<9xf32, #tpu.memory_space<smem>>
    %22 = vector.broadcast %21 : f32 to vector<8x256xf32>
    %23 = arith.mulf %2, %22 : vector<8x256xf32>
    %24 = arith.addf %20, %23 : vector<8x256xf32>
    %c255_i32 = arith.constant 255 : i32
    %25 = tpu.dynamic_rotate %24 by %c255_i32 dim 1 : vector<8x256xf32>, i32 -> vector<8x256xf32>
    %26 = arith.addf %13, %25 : vector<8x256xf32>
    %c2 = arith.constant 2 : index
    %27 = memref.load %arg1[%c2] : memref<9xf32, #tpu.memory_space<smem>>
    %28 = vector.broadcast %27 : f32 to vector<8x256xf32>
    %29 = arith.mulf %0, %28 : vector<8x256xf32>
    %c5 = arith.constant 5 : index
    %30 = memref.load %arg1[%c5] : memref<9xf32, #tpu.memory_space<smem>>
    %31 = vector.broadcast %30 : f32 to vector<8x256xf32>
    %32 = arith.mulf %1, %31 : vector<8x256xf32>
    %33 = arith.addf %29, %32 : vector<8x256xf32>
    %c8 = arith.constant 8 : index
    %34 = memref.load %arg1[%c8] : memref<9xf32, #tpu.memory_space<smem>>
    %35 = vector.broadcast %34 : f32 to vector<8x256xf32>
    %36 = arith.mulf %2, %35 : vector<8x256xf32>
    %37 = arith.addf %33, %36 : vector<8x256xf32>
    %c254_i32 = arith.constant 254 : i32
    %38 = tpu.dynamic_rotate %37 by %c254_i32 dim 1 : vector<8x256xf32>, i32 -> vector<8x256xf32>
    %39 = arith.addf %26, %38 : vector<8x256xf32>
    %c0_2 = arith.constant 0 : index
    %c0_3 = arith.constant 0 : index
    %40 = vector.load %arg3[%c0_2, %c0_3] : memref<8x256xf32, #tpu.memory_space<vmem>>, vector<8x256xf32>
    tpu.vector_store %arg3[%c0_2, %c0_3], %39 {strides = array<i32>} : memref<8x256xf32, #tpu.memory_space<vmem>>, vector<8x256xf32>,
    return
  }
  func.func @transform_0(%arg0: i32) -> i32 {
    %c0_i32 = arith.constant 0 : i32
    %c0_i32_0 = arith.constant 0 : i32
    return %c0_i32 : i32
  }
  func.func @transform_1(%arg0: i32) -> (i32, i32) {
    %c0_i32 = arith.constant 0 : i32
    %c0_i32_0 = arith.constant 0 : i32
    %c0_i32_1 = arith.constant 0 : i32
    return %c0_i32, %c0_i32_0 : i32, i32
  }
  func.func @transform_2(%arg0: i32) -> (i32, i32) {
    %c0_i32 = arith.constant 0 : i32
    %c0_i32_0 = arith.constant 0 : i32
    %c0_i32_1 = arith.constant 0 : i32
    return %c0_i32, %c0_i32_0 : i32, i32
  }
}

</mosaic_0001>

<bundles_post_ra>
// kernel: shared_conv_forward.1
= control target key start
LH: loop header
LB: loop body
LE: loop exit
PB: predicated region body
PF: predicated region fallthrough
CT: control target
= control target key end

     0   :  { %7 = vsyncpa [#allocation3], 0  ;;  %s205_s0 = inlined_call_operand.vmem [shape: f32[9], index: 0, kind: input, shape index: {}]   ;;  %s206_s1 = inlined_call_operand.vmem [shape: f32[8,256], index: 1, kind: input, shape index: {}]   ;;  %s207_s2 = inlined_call_operand.vmem [shape: f32[8,256], index: 2, kind: output, shape index: {}]  }
   0x1   :  { %s14_s11 = sshll.u32 %s205_s0, 4  ;;  %s15_s11 = int_to_ptr.vmem [resolvable:$true] %s14_s11 }
   0x2   :  { %s128_s12 = scalar_lea.vmem %s15_s11, 16  ;;  %p133_p1 = scmp.lt.s32.totalorder %s15_s11, %s15_s11 }
   0x3   :  { %p129_p0 = scmp.ne.s32.totalorder %s15_s11, %s128_s12  ;;  %p134_p2 = scmp.lt.s32.totalorder %s128_s12, %s128_s12 }
   0x5   :  { %p135_p3 = por %p134_p2, %p133_p1 }
   0x7   :  { %p136_p4 = pnand %p135_p3, %p129_p0 }
   0x9   :  { %139 = shalt.err (!%p136_p4)
}
   0xa   :  { %s142_s13 = smov [#allocation2]  }
   0xb   :  { %17 = dma.vmem_to_smem %s15_s11, 16, %s142_s13, [#allocation3]  }
   0xc   :  { %140 = dma.done.wait [#allocation3], 16  }
   0xd   :  { %141 = vsyncadd [#allocation3], 4294967280 }
   0xe   :  { %23 = sfence }
   0xf   :  { %v24_v0 = vld [vmem:[%s206_s1] sm:$0xff]  ;;  %s143_s16 = smov 96   ;;  %s144_s0 = smov 112   ;;  %v25_v1 = vld [vmem:[%s206_s1 + $0x8] sm:$0xff]  ;;  %v30_v2 = vlaneseq }
  0x10   :  { %35 = vrot.lane.b32.xlu1 %v24_v0, %s143_s16  ;;  %26 = vrot.lane.b32.xlu0 %v24_v0, %s144_s0  ;;  %s171_s19 = sld [smem:[#allocation2 + $0x6]]  ;;  %s145_s27 = smov 127  }
  0x11   :  { %s173_s20 = sld [smem:[#allocation2 + $0x7]]  ;;  %v181_v3 = vand.u32 127, %v30_v2  ;;  %s146_s28 = smov 126  }
  0x12   :  { %s42_s21 = sld [smem:[#allocation2]] }
  0x13   :  { %s175_s22 = sld [smem:[#allocation2 + $0x3]]  ;;  %vm32_vm0 = vcmp.lt.s32.totalorder %v181_v3, 112  ;;  %vm39_vm1 = vcmp.lt.s32.totalorder %v181_v3, 96  ;;  %vm78_vm2 = vcmp.lt.s32.totalorder %v181_v3, 127  ;;  %vm103_vm3 = vcmp.lt.s32.totalorder %v181_v3, 126 }
  0x14   :  { %37 = vrot.lane.b32.xlu1 %v25_v1, %s143_s16  ;;  %28 = vrot.lane.b32.xlu0 %v25_v1, %s144_s0  ;;  %s177_s23 = sld [smem:[#allocation2 + $0x4]] }
  0x15   :  { %s117_s24 = sld [smem:[#allocation2 + $0x1]] }
  0x16   :  { %s120_s25 = sld [smem:[#allocation2 + $0x2]]  ;;  %v53_v7 = vstv %s171_s19 }
  0x17   :  { %s179_s26 = sld [smem:[#allocation2 + $0x5]]  ;;  %v69_v8 = vstv %s173_s20 }
  0x18   :  { %v43_v6 = vstv %s42_s21  ;;  %s187_s1 = sld [smem:[#allocation2 + $0x8]] }
  0x19   :  { %v45_v11 = vmul.f32 %v43_v6, %v25_v1  ;;  %v47_v12 = vstv %s175_s22  ;;  %v44_v14 = vmul.f32 %v43_v6, %v24_v0 }
  0x1a   :  { %v63_v16 = vstv %s177_s23 }
  0x1b   :  { %v59_v9 = vstv %s117_s24 }
  0x1c   :  { %v84_v15 = vstv %s120_s25  ;;  %v61_v22 = vmul.f32 %v59_v9, %v25_v1  ;;  %v60_v23 = vmul.f32 %v59_v9, %v24_v0 }
  0x1d   :  { %v88_v17 = vstv %s179_s26  ;;  %v86_v26 = vmul.f32 %v84_v15, %v25_v1  ;;  %v85_v27 = vmul.f32 %v84_v15, %v24_v0 }
  0x1e   :  { %v94_v40 = vstv %s187_s1 }
  0x82   :  { %v36_v4 = vpop.permute.xlu1 %35  ;;  %v27_v5 = vpop.permute.xlu0 %26 }
  0x86   :  { %v38_v10 = vpop.permute.xlu1 %37  ;;  %v29_v13 = vpop.permute.xlu0 %28 }
  0x87   :  { %v33_v18 = vsel %vm32_vm0, %v27_v5, %v29_v13  ;;  %v34_v19 = vsel %vm32_vm0, %v29_v13, %v27_v5  ;;  %v40_v20 = vsel %vm39_vm1, %v36_v4, %v38_v10  ;;  %v41_v21 = vsel %vm39_vm1, %v38_v10, %v36_v4 }
  0x88   :  { %v48_v24 = vmul.f32 %v47_v12, %v33_v18  ;;  %v49_v25 = vmul.f32 %v47_v12, %v34_v19  ;;  %v64_v28 = vmul.f32 %v63_v16, %v33_v18  ;;  %v65_v29 = vmul.f32 %v63_v16, %v34_v19 }
  0x89   :  { %v89_v30 = vmul.f32 %v88_v17, %v33_v18  ;;  %v90_v31 = vmul.f32 %v88_v17, %v34_v19  ;;  %v54_v32 = vmul.f32 %v53_v7, %v40_v20  ;;  %v55_v33 = vmul.f32 %v53_v7, %v41_v21 }
  0x8a   :  { %v50_v34 = vadd.f32 %v48_v24, %v44_v14  ;;  %v51_v35 = vadd.f32 %v49_v25, %v45_v11  ;;  %v70_v36 = vmul.f32 %v69_v8, %v40_v20  ;;  %v71_v37 = vmul.f32 %v69_v8, %v41_v21 }
  0x8b   :  { %v67_v38 = vadd.f32 %v65_v29, %v61_v22  ;;  %v66_v39 = vadd.f32 %v64_v28, %v60_v23  ;;  %v92_v45 = vadd.f32 %v90_v31, %v86_v26  ;;  %v91_v46 = vadd.f32 %v89_v30, %v85_v27 }
  0x8c   :  { %v57_v41 = vadd.f32 %v55_v33, %v51_v35  ;;  %v56_v42 = vadd.f32 %v54_v32, %v50_v34  ;;  %v95_v47 = vmul.f32 %v94_v40, %v40_v20  ;;  %v96_v48 = vmul.f32 %v94_v40, %v41_v21 }
  0x8d   :  { %v73_v43 = vadd.f32 %v71_v37, %v67_v38  ;;  %v72_v44 = vadd.f32 %v70_v36, %v66_v39 }
  0x8e   :  { %v98_v49 = vadd.f32 %v96_v48, %v92_v45  ;;  %v97_v50 = vadd.f32 %v95_v47, %v91_v46 }
  0x8f   :  { %76 = vrot.lane.b32.xlu1 %v73_v43, %s145_s27  ;;  %74 = vrot.lane.b32.xlu0 %v72_v44, %s145_s27 }
  0x93   :  { %101 = vrot.lane.b32.xlu1 %v98_v49, %s146_s28  ;;  %99 = vrot.lane.b32.xlu0 %v97_v50, %s146_s28 }
 0x101   :  { %v77_v51 = vpop.permute.xlu1 %76  ;;  %v75_v52 = vpop.permute.xlu0 %74 }
 0x102   :  { %v79_v53 = vsel %vm78_vm2, %v75_v52, %v77_v51  ;;  %v80_v54 = vsel %vm78_vm2, %v77_v51, %v75_v52 }
 0x103   :  { %v81_v55 = vadd.f32 %v79_v53, %v56_v42  ;;  %v82_v56 = vadd.f32 %v80_v54, %v57_v41 }
 0x105   :  { %v102_v57 = vpop.permute.xlu1 %101  ;;  %v100_v58 = vpop.permute.xlu0 %99 }
 0x106   :  { %v104_v59 = vsel %vm103_vm3, %v100_v58, %v102_v57  ;;  %v105_v60 = vsel %vm103_vm3, %v102_v57, %v100_v58 }
 0x107   :  { %v106_v61 = vadd.f32 %v104_v59, %v81_v55  ;;  %v107_v62 = vadd.f32 %v105_v60, %v82_v56 }
 0x109   :  { %108 = vst [vmem:[%s207_s2] sm:$0xff] %v106_v61  ;;  %109 = vst [vmem:[%s207_s2 + $0x8] sm:$0xff] %v107_v62 }
 0x10a   :  { %114 = vsyncpa [#allocation3], 1 }

</bundles_post_ra>
